<compile_context>
chip_gen: v7x
topology: tpu7x:2x2x1
jax: 0.10.0
libtpu: 0.0.40
codegen_flags: <defaults>
</compile_context>

<pallas_src>
import jax
import jax.numpy as jnp
from jax.experimental import pallas as pl
from jax.experimental.pallas import tpu as pltpu

_LANE = 128


def _round_up(x, m):
    return (x + m - 1) // m * m


def _pad_to(x, shape):
    """Zero-pad a 2-D array up to `shape` (top-left aligned)."""
    pads = [(0, t - s) for s, t in zip(x.shape, shape)]
    return jnp.pad(x, pads)


def _inv_mlp_kernel(state_ref, next_state_ref,
                    w1a_ref, w1b_ref, b1_ref,
                    w2_ref, b2_ref,
                    w3_ref, b3_ref,
                    out_ref):
    """One batch tile of the 3-layer MLP. Weights/biases are VMEM-resident."""
    cdt = w1a_ref.dtype  # MXU operand dtype (bf16 on the fast path, else f32)

    s = state_ref[...].astype(cdt)
    ns = next_state_ref[...].astype(cdt)

    # Layer 1 (concat-free): cat([s, ns]) @ W1 == s @ W1[:obs] + ns @ W1[obs:]
    h1 = (jnp.dot(s, w1a_ref[...], preferred_element_type=jnp.float32)
          + jnp.dot(ns, w1b_ref[...], preferred_element_type=jnp.float32))
    h1 = jnp.maximum(h1 + b1_ref[...], 0.0)          # f32 epilogue

    # Layer 2
    h2 = jnp.dot(h1.astype(cdt), w2_ref[...], preferred_element_type=jnp.float32)
    h2 = jnp.maximum(h2 + b2_ref[...], 0.0)

    # Layer 3 (no activation)
    out = jnp.dot(h2.astype(cdt), w3_ref[...], preferred_element_type=jnp.float32)
    out = out + b3_ref[...]

    out_ref[...] = out.astype(out_ref.dtype)


def inv_function_forward(state, next_state, params, *, tile_b=128, use_bf16=True):
    """InvFunction forward pass as one Pallas kernel.

    state, next_state: (B, obs_dim) float32
    params: w1 (2*obs_dim, H), b1 (1, H), w2 (H, H), b2 (1, H),
            w3 (H, A), b3 (1, A)   (weights pre-transposed: in_dim x out_dim)
    returns: (B, A) float32
    """
    B, obs_dim = state.shape
    H = params["w1"].shape[1]
    A = params["w3"].shape[1]

    H_pad = _round_up(H, _LANE)
    A_pad = _round_up(A, _LANE)
    wdt = jnp.bfloat16 if use_bf16 else jnp.float32

    # Split W1 (kills the in-kernel concat) and lane-pad everything to 128.
    w1a = _pad_to(params["w1"][:obs_dim], (obs_dim, H_pad)).astype(wdt)
    w1b = _pad_to(params["w1"][obs_dim:], (obs_dim, H_pad)).astype(wdt)
    b1 = _pad_to(params["b1"], (1, H_pad)).astype(jnp.float32)
    w2 = _pad_to(params["w2"], (H_pad, H_pad)).astype(wdt)
    b2 = _pad_to(params["b2"], (1, H_pad)).astype(jnp.float32)
    w3 = _pad_to(params["w3"], (H_pad, A_pad)).astype(wdt)
    b3 = _pad_to(params["b3"], (1, A_pad)).astype(jnp.float32)

    # Batch tile: whole batch if it fits in one tile (block == full dim is
    # always legal), otherwise 128-row tiles (partial last tile is masked).
    tb = B if B <= tile_b else tile_b
    grid = (pl.cdiv(B, tb),)

    resident = lambda shape: pl.BlockSpec(shape, lambda i: (0, 0))
    batched = lambda feat: pl.BlockSpec((tb, feat), lambda i: (i, 0))

    wbytes = 2 if use_bf16 else 4
    flops = 2 * B * (2 * obs_dim * H_pad + H_pad * H_pad + H_pad * A_pad)
    bytes_accessed = ((2 * B * obs_dim + B * A_pad) * 4
                      + (2 * obs_dim * H_pad + H_pad * H_pad + H_pad * A_pad) * wbytes
                      + (2 * H_pad + A_pad) * 4)

    out_padded = pl.pallas_call(
        _inv_mlp_kernel,
        out_shape=jax.ShapeDtypeStruct((B, A_pad), jnp.float32),
        grid=grid,
        in_specs=[
            batched(obs_dim),            # state
            batched(obs_dim),            # next_state
            resident((obs_dim, H_pad)),  # w1a
            resident((obs_dim, H_pad)),  # w1b
            resident((1, H_pad)),        # b1
            resident((H_pad, H_pad)),    # w2
            resident((1, H_pad)),        # b2
            resident((H_pad, A_pad)),    # w3
            resident((1, A_pad)),        # b3
        ],
        out_specs=batched(A_pad),
        compiler_params=pltpu.CompilerParams(
            dimension_semantics=("parallel",)),
        cost_estimate=pl.CostEstimate(flops=flops, transcendentals=0,
                                      bytes_accessed=bytes_accessed),
    )(state, next_state, w1a, w1b, b1, w2, b2, w3, b3)

    # Drop the lane padding on the action dimension.
    return out_padded[:, :A]


def init_params(key, obs_dim, action_dim, hidden_dim):
    """Deterministic synthetic init mirroring nn.Linear shapes.

    Weights are stored transposed: (in_features, out_features)."""
    ks = jax.random.split(key, 6)

    def linear(kw, kb, fan_in, fan_out):
        bound = 1.0 / jnp.sqrt(fan_in)
        w = jax.random.uniform(kw, (fan_in, fan_out), jnp.float32, -bound, bound)
        b = jax.random.uniform(kb, (1, fan_out), jnp.float32, -bound, bound)
        return w, b

    w1, b1 = linear(ks[0], ks[1], 2 * obs_dim, hidden_dim)
    w2, b2 = linear(ks[2], ks[3], hidden_dim, hidden_dim)
    w3, b3 = linear(ks[4], ks[5], hidden_dim, action_dim)
    return {"w1": w1, "b1": b1, "w2": w2, "b2": b2, "w3": w3, "b3": b3}


def _reference_forward(state, next_state, p, use_bf16=False):
    """Pure-JAX reference with the same matmul-operand precision as the kernel."""
    mdt = jnp.bfloat16 if use_bf16 else jnp.float32
    dot = lambda x, w: jnp.dot(x.astype(mdt), w.astype(mdt),
                               preferred_element_type=jnp.float32)
    joint = jnp.concatenate([state, next_state], axis=1)
    h1 = jnp.maximum(dot(joint, p["w1"]) + p["b1"], 0.0)
    h2 = jnp.maximum(dot(h1, p["w2"]) + p["b2"], 0.0)
    return dot(h2, p["w3"]) + p["b3"]


if __name__ == "__main__":
    obs_dim, action_dim, hidden_dim = 16, 4, 32
    batch = 8

    key = jax.random.PRNGKey(0)
    k_params, k_s, k_ns = jax.random.split(key, 3)

    params = init_params(k_params, obs_dim, action_dim, hidden_dim)
    state = jax.random.normal(k_s, (batch, obs_dim), jnp.float32)
    next_state = jax.random.normal(k_ns, (batch, obs_dim), jnp.float32)

    # Exact-precision path: f32 MXU operands vs. f32 reference.
    out_f32 = jax.block_until_ready(
        inv_function_forward(state, next_state, params, use_bf16=False))
    ref_f32 = _reference_forward(state, next_state, params, use_bf16=False)
    assert out_f32.shape == (batch, action_dim)
    assert jnp.allclose(out_f32, ref_f32, atol=1e-4, rtol=1e-4), \
        float(jnp.max(jnp.abs(out_f32 - ref_f32)))

    # Performance path: bf16 MXU operands, f32 accumulation + epilogue.
    out_bf16 = jax.block_until_ready(
        inv_function_forward(state, next_state, params, use_bf16=True))
    ref_bf16 = _reference_forward(state, next_state, params, use_bf16=True)
    assert out_bf16.shape == (batch, action_dim)
    assert jnp.allclose(out_bf16, ref_bf16, atol=5e-3, rtol=5e-3), \
        float(jnp.max(jnp.abs(out_bf16 - ref_bf16)))

    print("KERNEL_OK")
</pallas_src>

<mosaic_0001>
module attributes {stable_mosaic.version = 11 : i64} {
  func.func @_inv_mlp_kernel(%arg0: i32, %arg1: memref<8x16xf32, #tpu.memory_space<vmem>>, %arg2: memref<8x16xf32, #tpu.memory_space<vmem>>, %arg3: memref<16x128xf32, #tpu.memory_space<vmem>>, %arg4: memref<16x128xf32, #tpu.memory_space<vmem>>, %arg5: memref<1x128xf32, #tpu.memory_space<vmem>>, %arg6: memref<128x128xf32, #tpu.memory_space<vmem>>, %arg7: memref<1x128xf32, #tpu.memory_space<vmem>>, %arg8: memref<128x128xf32, #tpu.memory_space<vmem>>, %arg9: memref<1x128xf32, #tpu.memory_space<vmem>>, %arg10: memref<8x128xf32, #tpu.memory_space<vmem>>) attributes {dimension_semantics = [#tpu.dimension_semantics<parallel>], iteration_bounds = array<i64: 1>, scalar_prefetch = 0 : i64, scratch_operands = 0 : i64, tpu.core_type = #tpu.core_type<tc>, window_params = [{transform_indices = @transform_0, window_bounds = array<i64: 8, 16>}, {transform_indices = @transform_1, window_bounds = array<i64: 8, 16>}, {pipeline_mode = #tpu.pipeline_mode<synchronous>, transform_indices = @transform_2, window_bounds = array<i64: 16, 128>}, {pipeline_mode = #tpu.pipeline_mode<synchronous>, transform_indices = @transform_3, window_bounds = array<i64: 16, 128>}, {pipeline_mode = #tpu.pipeline_mode<synchronous>, transform_indices = @transform_4, window_bounds = array<i64: 1, 128>}, {pipeline_mode = #tpu.pipeline_mode<synchronous>, transform_indices = @transform_5, window_bounds = array<i64: 128, 128>}, {pipeline_mode = #tpu.pipeline_mode<synchronous>, transform_indices = @transform_6, window_bounds = array<i64: 1, 128>}, {pipeline_mode = #tpu.pipeline_mode<synchronous>, transform_indices = @transform_7, window_bounds = array<i64: 128, 128>}, {pipeline_mode = #tpu.pipeline_mode<synchronous>, transform_indices = @transform_8, window_bounds = array<i64: 1, 128>}, {transform_indices = @transform_9, window_bounds = array<i64: 8, 128>}]} {
    %c0 = arith.constant 0 : index
    %c0_0 = arith.constant 0 : index
    %0 = vector.load %arg1[%c0, %c0_0] : memref<8x16xf32, #tpu.memory_space<vmem>>, vector<8x16xf32>
    %c0_1 = arith.constant 0 : index
    %c0_2 = arith.constant 0 : index
    %1 = vector.load %arg2[%c0_1, %c0_2] : memref<8x16xf32, #tpu.memory_space<vmem>>, vector<8x16xf32>
    %c0_3 = arith.constant 0 : index
    %c0_4 = arith.constant 0 : index
    %2 = vector.load %arg3[%c0_3, %c0_4] : memref<16x128xf32, #tpu.memory_space<vmem>>, vector<16x128xf32>
    %cst = arith.constant dense<0.000000e+00> : vector<8x128xf32>
    %3 = tpu.matmul %0, %2, %cst {dimension_numbers = #tpu.dot_dimension_numbers<[1], [0], [0], [1], [0, 0, 1, 1], [], []>} : vector<8x16xf32>, vector<16x128xf32>, vector<8x128xf32> -> vector<8x128xf32>
    %c0_5 = arith.constant 0 : index
    %c0_6 = arith.constant 0 : index
    %4 = vector.load %arg4[%c0_5, %c0_6] : memref<16x128xf32, #tpu.memory_space<vmem>>, vector<16x128xf32>
    %cst_7 = arith.constant dense<0.000000e+00> : vector<8x128xf32>
    %5 = tpu.matmul %1, %4, %cst_7 {dimension_numbers = #tpu.dot_dimension_numbers<[1], [0], [0], [1], [0, 0, 1, 1], [], []>} : vector<8x16xf32>, vector<16x128xf32>, vector<8x128xf32> -> vector<8x128xf32>
    %6 = arith.addf %3, %5 : vector<8x128xf32>
    %c0_8 = arith.constant 0 : index
    %c0_9 = arith.constant 0 : index
    %7 = vector.load %arg5[%c0_8, %c0_9] : memref<1x128xf32, #tpu.memory_space<vmem>>, vector<1x128xf32>
    %8 = vector.broadcast %7 : vector<1x128xf32> to vector<8x128xf32>
    %9 = arith.addf %6, %8 : vector<8x128xf32>
    %cst_10 = arith.constant 0.000000e+00 : f32
    %10 = vector.broadcast %cst_10 : f32 to vector<8x128xf32>
    %11 = arith.maximumf %9, %10 : vector<8x128xf32>
    %c0_11 = arith.constant 0 : index
    %c0_12 = arith.constant 0 : index
    %12 = vector.load %arg6[%c0_11, %c0_12] : memref<128x128xf32, #tpu.memory_space<vmem>>, vector<128x128xf32>
    %cst_13 = arith.constant dense<0.000000e+00> : vector<8x128xf32>
    %13 = tpu.matmul %11, %12, %cst_13 {dimension_numbers = #tpu.dot_dimension_numbers<[1], [0], [0], [1], [0, 0, 1, 1], [], []>} : vector<8x128xf32>, vector<128x128xf32>, vector<8x128xf32> -> vector<8x128xf32>
    %c0_14 = arith.constant 0 : index
    %c0_15 = arith.constant 0 : index
    %14 = vector.load %arg7[%c0_14, %c0_15] : memref<1x128xf32, #tpu.memory_space<vmem>>, vector<1x128xf32>
    %15 = vector.broadcast %14 : vector<1x128xf32> to vector<8x128xf32>
    %16 = arith.addf %13, %15 : vector<8x128xf32>
    %cst_16 = arith.constant 0.000000e+00 : f32
    %17 = vector.broadcast %cst_16 : f32 to vector<8x128xf32>
    %18 = arith.maximumf %16, %17 : vector<8x128xf32>
    %c0_17 = arith.constant 0 : index
    %c0_18 = arith.constant 0 : index
    %19 = vector.load %arg8[%c0_17, %c0_18] : memref<128x128xf32, #tpu.memory_space<vmem>>, vector<128x128xf32>
    %cst_19 = arith.constant dense<0.000000e+00> : vector<8x128xf32>
    %20 = tpu.matmul %18, %19, %cst_19 {dimension_numbers = #tpu.dot_dimension_numbers<[1], [0], [0], [1], [0, 0, 1, 1], [], []>} : vector<8x128xf32>, vector<128x128xf32>, vector<8x128xf32> -> vector<8x128xf32>
    %c0_20 = arith.constant 0 : index
    %c0_21 = arith.constant 0 : index
    %21 = vector.load %arg9[%c0_20, %c0_21] : memref<1x128xf32, #tpu.memory_space<vmem>>, vector<1x128xf32>
    %22 = vector.broadcast %21 : vector<1x128xf32> to vector<8x128xf32>
    %23 = arith.addf %20, %22 : vector<8x128xf32>
    %c0_22 = arith.constant 0 : index
    %c0_23 = arith.constant 0 : index
    %24 = vector.load %arg10[%c0_22, %c0_23] : memref<8x128xf32, #tpu.memory_space<vmem>>, vector<8x128xf32>
    tpu.vector_store %arg10[%c0_22, %c0_23], %23 {strides = array<i32>} : memref<8x128xf32, #tpu.memory_space<vmem>>, vector<8x128xf32>,
    return
  }
  func.func @transform_0(%arg0: i32) -> (i32, i32) {
    %c0_i32 = arith.constant 0 : i32
    %c0_i32_0 = arith.constant 0 : i32
    return %arg0, %c0_i32 : i32, i32
  }
  func.func @transform_1(%arg0: i32) -> (i32, i32) {
    %c0_i32 = arith.constant 0 : i32
    %c0_i32_0 = arith.constant 0 : i32
    return %arg0, %c0_i32 : i32, i32
  }
  func.func @transform_2(%arg0: i32) -> (i32, i32) {
    %c0_i32 = arith.constant 0 : i32
    %c0_i32_0 = arith.constant 0 : i32
    %c0_i32_1 = arith.constant 0 : i32
    return %c0_i32, %c0_i32_0 : i32, i32
  }
  func.func @transform_3(%arg0: i32) -> (i32, i32) {
    %c0_i32 = arith.constant 0 : i32
    %c0_i32_0 = arith.constant 0 : i32
    %c0_i32_1 = arith.constant 0 : i32
    return %c0_i32, %c0_i32_0 : i32, i32
  }
  func.func @transform_4(%arg0: i32) -> (i32, i32) {
    %c0_i32 = arith.constant 0 : i32
    %c0_i32_0 = arith.constant 0 : i32
    %c0_i32_1 = arith.constant 0 : i32
    return %c0_i32, %c0_i32_0 : i32, i32
  }
  func.func @transform_5(%arg0: i32) -> (i32, i32) {
    %c0_i32 = arith.constant 0 : i32
    %c0_i32_0 = arith.constant 0 : i32
    %c0_i32_1 = arith.constant 0 : i32
    return %c0_i32, %c0_i32_0 : i32, i32
  }
  func.func @transform_6(%arg0: i32) -> (i32, i32) {
    %c0_i32 = arith.constant 0 : i32
    %c0_i32_0 = arith.constant 0 : i32
    %c0_i32_1 = arith.constant 0 : i32
    return %c0_i32, %c0_i32_0 : i32, i32
  }
  func.func @transform_7(%arg0: i32) -> (i32, i32) {
    %c0_i32 = arith.constant 0 : i32
    %c0_i32_0 = arith.constant 0 : i32
    %c0_i32_1 = arith.constant 0 : i32
    return %c0_i32, %c0_i32_0 : i32, i32
  }
  func.func @transform_8(%arg0: i32) -> (i32, i32) {
    %c0_i32 = arith.constant 0 : i32
    %c0_i32_0 = arith.constant 0 : i32
    %c0_i32_1 = arith.constant 0 : i32
    return %c0_i32, %c0_i32_0 : i32, i32
  }
  func.func @transform_9(%arg0: i32) -> (i32, i32) {
    %c0_i32 = arith.constant 0 : i32
    %c0_i32_0 = arith.constant 0 : i32
    return %arg0, %c0_i32 : i32, i32
  }
}

</mosaic_0001>

<bundles_post_ra>
// kernel: tpu_custom_call.1
= control target key start
LH: loop header
LB: loop body
LE: loop exit
PB: predicated region body
PF: predicated region fallthrough
CT: control target
= control target key end

     0   :  { %14 = vsyncpa [#allocation3], 0  ;;  %s1027_s0 = inlined_call_operand.hbm [shape: f32[8,16], index: 0, kind: input, shape index: {}]   ;;  %s1028_s1 = inlined_call_operand.hbm [shape: f32[8,16], index: 1, kind: input, shape index: {}]   ;;  %s1029_s2 = inlined_call_operand.hbm [shape: f32[16,128], index: 2, kind: input, shape index: {}]   ;;  %s1030_s3 = inlined_call_operand.hbm [shape: f32[16,128], index: 3, kind: input, shape index: {}]   ;;  %s1031_s4 = inlined_call_operand.vmem [shape: f32[1,128], index: 4, kind: input, shape index: {}]   ;;  %s1032_s5 = inlined_call_operand.hbm [shape: f32[128,128], index: 5, kind: input, shape index: {}]   ;;  %s1033_s6 = inlined_call_operand.vmem [shape: f32[1,128], index: 6, kind: input, shape index: {}]   ;;  %s1034_s7 = inlined_call_operand.hbm [shape: f32[128,128], index: 7, kind: input, shape index: {}]   ;;  %s1035_s8 = inlined_call_operand.vmem [shape: f32[1,128], index: 8, kind: input, shape index: {}]   ;;  %s1036_s9 = inlined_call_operand.hbm [shape: f32[8,128], index: 9, kind: output, shape index: {}]  }
   0x1   :  { %15 = vsyncpa [#allocation6], 0 }
   0x2   :  { %16 = vsyncpa [#allocation9], 0 }
   0x3   :  { %17 = vsyncpa [#allocation12], 0 }
   0x4   :  { %18 = vsyncpa [#allocation4], 0  ;;  %s838_s30 = smov [#allocation5]   ;;  %s674_s13 = scalar_lea.hbm %s1028_s1, 128 }
   0x5   :  { %s35_s10 = sshll.u32 %s838_s30, 4  ;;  %p675_p0 = scmp.ne.s32.totalorder %s1028_s1, %s674_s13  ;;  %s36_s10 = int_to_ptr.vmem [resolvable:$true] %s35_s10 }
   0x6   :  { %p678_p1 = scmp.lt.u32.totalorder %s674_s13, %s1028_s1 }
   0x8   :  { %p680_p2 = pnand %p678_p1, %p675_p0 }
   0xa   :  { %683 = shalt.err (!%p680_p2)
}
   0xb   :  { %s684_s18 = scalar_lea.vmem %s36_s10, 128  ;;  %p689_p4 = scmp.lt.s32.totalorder %s36_s10, %s36_s10 }
   0xc   :  { %p685_p3 = scmp.ne.s32.totalorder %s36_s10, %s684_s18  ;;  %p690_p5 = scmp.lt.s32.totalorder %s684_s18, %s684_s18 }
   0xe   :  { %p691_p6 = por %p690_p5, %p689_p4 }
  0x10   :  { %p692_p7 = pnand %p691_p6, %p685_p3 }
  0x12   :  { %695 = shalt.err (!%p692_p7)
}
  0x13   :  { %38 = dma.hbm_to_vmem [thread:$0]  %s1028_s1, 128, %s36_s10, [#allocation6]  }
  0x14   :  { %s839_s21 = smov [#allocation8]   ;;  %s840_s23 = smov [#allocation2]  }
  0x15   :  { %s56_s22 = sshll.u32 %s839_s21, 4  ;;  %s25_s24 = sshll.u32 %s840_s23, 4  ;;  %s57_s22 = int_to_ptr.vmem [resolvable:$true] %s56_s22  ;;  %s26_s24 = int_to_ptr.vmem [resolvable:$true] %s25_s24 }
  0x16   :  { %s696_s27 = scalar_lea.hbm %s1030_s3, 256 }
  0x17   :  { %p697_p8 = scmp.ne.s32.totalorder %s1030_s3, %s696_s27  ;;  %p700_p9 = scmp.lt.u32.totalorder %s696_s27, %s1030_s3 }
  0x19   :  { %p702_p10 = pnand %p700_p9, %p697_p8 }
  0x1b   :  { %705 = shalt.err (!%p702_p10)
}
  0x1c   :  { %s706_s1 = scalar_lea.vmem %s57_s22, 256  ;;  %p711_p12 = scmp.lt.s32.totalorder %s57_s22, %s57_s22 }
  0x1d   :  { %p707_p11 = scmp.ne.s32.totalorder %s57_s22, %s706_s1  ;;  %p712_p13 = scmp.lt.s32.totalorder %s706_s1, %s706_s1 }
  0x1f   :  { %p713_p0 = por %p712_p13, %p711_p12 }
  0x21   :  { %p714_p1 = pnand %p713_p0, %p707_p11 }
  0x23   :  { %717 = shalt.err (!%p714_p1)
}
  0x24   :  { %s841_s10 = smov 128   ;;  %s842_s12 = smov 8  }
  0x25   :  { %62 = dma.hbm_to_vmem [thread:$0]  %s1030_s3, 256, %s57_s22, [#allocation9], %s841_s10, %s841_s10, %s842_s12  }
  0x26   :  { %s718_s17 = scalar_lea.hbm %s1027_s0, 128 }
  0x27   :  { %p719_p2 = scmp.ne.s32.totalorder %s1027_s0, %s718_s17  ;;  %p722_p3 = scmp.lt.u32.totalorder %s718_s17, %s1027_s0 }
  0x29   :  { %p724_p4 = pnand %p722_p3, %p719_p2 }
  0x2b   :  { %727 = shalt.err (!%p724_p4)
}
  0x2c   :  { %s728_s23 = scalar_lea.vmem %s26_s24, 128  ;;  %p733_p6 = scmp.lt.s32.totalorder %s26_s24, %s26_s24 }
  0x2d   :  { %p729_p5 = scmp.ne.s32.totalorder %s26_s24, %s728_s23  ;;  %p734_p7 = scmp.lt.s32.totalorder %s728_s23, %s728_s23 }
  0x2f   :  { %p735_p8 = por %p734_p7, %p733_p6 }
  0x31   :  { %p736_p9 = pnand %p735_p8, %p729_p5 }
  0x33   :  { %739 = shalt.err (!%p736_p9)
}
  0x34   :  { %28 = dma.hbm_to_vmem [thread:$0]  %s1027_s0, 128, %s26_s24, [#allocation3]  }
  0x35   :  { %s843_s25 = smov [#allocation7]   ;;  %s844_s27 = smov [#allocation10]  }
  0x36   :  { %s44_s26 = sshll.u32 %s843_s25, 4  ;;  %s70_s28 = sshll.u32 %s844_s27, 4  ;;  %s45_s26 = int_to_ptr.vmem [resolvable:$true] %s44_s26  ;;  %s71_s28 = int_to_ptr.vmem [resolvable:$true] %s70_s28 }
  0x37   :  { %s740_s11 = scalar_lea.hbm %s1029_s2, 256 }
  0x38   :  { %p741_p10 = scmp.ne.s32.totalorder %s1029_s2, %s740_s11  ;;  %p744_p11 = scmp.lt.u32.totalorder %s740_s11, %s1029_s2 }
  0x3a   :  { %p746_p12 = pnand %p744_p11, %p741_p10 }
  0x3c   :  { %749 = shalt.err (!%p746_p12)
}
  0x3d   :  { %s750_s0 = scalar_lea.vmem %s45_s26, 256  ;;  %p755_p0 = scmp.lt.s32.totalorder %s45_s26, %s45_s26 }
  0x3e   :  { %p751_p13 = scmp.ne.s32.totalorder %s45_s26, %s750_s0  ;;  %p756_p1 = scmp.lt.s32.totalorder %s750_s0, %s750_s0 }
  0x40   :  { %p757_p2 = por %p756_p1, %p755_p0 }
  0x42   :  { %p758_p3 = pnand %p757_p2, %p751_p13 }
  0x44   :  { %761 = shalt.err (!%p758_p3)
}
  0x45   :  { %50 = dma.hbm_to_vmem [thread:$0]  %s1029_s2, 256, %s45_s26, [#allocation6], %s841_s10, %s841_s10, %s842_s12  }
  0x46   :  { %s762_s19 = scalar_lea.hbm %s1032_s5, 2048 }
  0x47   :  { %p763_p4 = scmp.ne.s32.totalorder %s1032_s5, %s762_s19  ;;  %p766_p5 = scmp.lt.u32.totalorder %s762_s19, %s1032_s5 }
  0x49   :  { %p768_p6 = pnand %p766_p5, %p763_p4 }
  0x4b   :  { %771 = shalt.err (!%p768_p6)
}
  0x4c   :  { %s772_s22 = scalar_lea.vmem %s71_s28, 2048  ;;  %p777_p8 = scmp.lt.s32.totalorder %s71_s28, %s71_s28 }
  0x4d   :  { %p773_p7 = scmp.ne.s32.totalorder %s71_s28, %s772_s22  ;;  %p778_p9 = scmp.lt.s32.totalorder %s772_s22, %s772_s22 }
  0x4f   :  { %p779_p10 = por %p778_p9, %p777_p8 }
  0x51   :  { %p780_p11 = pnand %p779_p10, %p773_p7 }
  0x53   :  { %783 = shalt.err (!%p780_p11)
}
  0x54   :  { %76 = dma.hbm_to_vmem [thread:$0]  %s1032_s5, 2048, %s71_s28, [#allocation9], %s841_s10, %s841_s10, %s842_s12  }
  0x55   :  { %s845_s26 = smov [#allocation11]   ;;  %s784_s11 = scalar_lea.hbm %s1034_s7, 2048 }
  0x56   :  { %s84_s27 = sshll.u32 %s845_s26, 4  ;;  %p785_p12 = scmp.ne.s32.totalorder %s1034_s7, %s784_s11  ;;  %s85_s27 = int_to_ptr.vmem [resolvable:$true] %s84_s27 }
  0x57   :  { %p788_p13 = scmp.lt.u32.totalorder %s784_s11, %s1034_s7 }
  0x59   :  { %p790_p0 = pnand %p788_p13, %p785_p12 }
  0x5b   :  { %793 = shalt.err (!%p790_p0)
}
  0x5c   :  { %s794_s0 = scalar_lea.vmem %s85_s27, 2048  ;;  %p799_p2 = scmp.lt.s32.totalorder %s85_s27, %s85_s27 }
  0x5d   :  { %p795_p1 = scmp.ne.s32.totalorder %s85_s27, %s794_s0  ;;  %p800_p3 = scmp.lt.s32.totalorder %s794_s0, %s794_s0 }
  0x5f   :  { %p801_p4 = por %p800_p3, %p799_p2 }
  0x61   :  { %p802_p5 = pnand %p801_p4, %p795_p1 }
  0x63   :  { %805 = shalt.err (!%p802_p5)
}
  0x64   :  { %90 = dma.hbm_to_vmem [thread:$0]  %s1034_s7, 2048, %s85_s27, [#allocation12], %s841_s10, %s841_s10, %s842_s12  }
  0x65   :  { %828 = dma.done.wait [#allocation3], 128  }
  0x66   :  { %829 = vsyncadd [#allocation3], 4294967168 }
  0x67   :  { %830 = dma.done.wait [#allocation6], 384  }
  0x68   :  { %831 = vsyncadd [#allocation6], 4294966912 }
  0x69   :  { %832 = dma.done.wait [#allocation9], 2304  }
  0x6a   :  { %833 = vsyncadd [#allocation9], 4294964992 }
  0x6b   :  { %834 = dma.done.wait [#allocation12], 2048  }
  0x6c   :  { %835 = vsyncadd [#allocation12], 4294965248  ;;  %v846_v0 = vmov 0.0|0.0   ;;  %vm847_vm0 = vmmov 0   ;;  %v848_v1 = vmov 0.0   ;;  %v115_v2 = vld [vmem:[#allocation8] sm:$0xff] }
  0x6d   :  { %608 = vmatprep.subr.bf16.mxu0 %v846_v0  ;;  %611 = vmatprep.subr.bf16.mxu1 %v846_v0  ;;  %v116_v3 = vld [vmem:[#allocation8 + $0x8] sm:$0xff]  ;;  %v113_v4 = vld [vmem:[#allocation7] sm:$0xff]  ;;  %v114_v6 = vld [vmem:[#allocation7 + $0x8] sm:$0xff]  ;;  %vm117_vm1 = vcmask 130048   ;;  %s849_s17 = smov [#allocation13]  }
  0x6e   :  { %528 = vmatprep.mubr.msk.f32.mxu0 %vm847_vm0, %v848_v1  ;;  %535 = vmatprep.mubr.msk.f32.mxu1 %vm847_vm0, %v848_v1  ;;  %v609_v5 = vpack.c.bf16 %v116_v3, %v115_v2  ;;  %v612_v7 = vpack.c.bf16 %v114_v6, %v113_v4  ;;  %v273_v8 = vld [vmem:[#allocation10] sm:$0xff]  ;;  %v274_v9 = vld [vmem:[#allocation10 + $0x8] sm:$0xff]  ;;  %v112_v10 = vld [vmem:[#allocation5] sm:$0xff]  ;;  %s467_s18 = sshll.u32 %s849_s17, 4  ;;  %s468_s18 = int_to_ptr.vmem [resolvable:$true] %s467_s18 }
  0x6f   :  { %v615_v11 = vpack.c.bf16 %v274_v9, %v273_v8  ;;  %v111_v12 = vld [vmem:[#allocation2] sm:$0xff]  ;;  %v276_v14 = vld [vmem:[#allocation10 + $0x18] sm:$0xff]  ;;  %v277_v16 = vld [vmem:[#allocation10 + $0x20] sm:$0xff]  ;;  %s806_s19 = scalar_lea.vmem %s468_s18, 128  ;;  %p811_p7 = scmp.lt.s32.totalorder %s468_s18, %s468_s18 }
  0x70   :  { %610 = vmatpush3.bf16.msra.mxu0 %v609_v5  ;;  %613 = vmatpush3.bf16.msra.mxu1 %v612_v7  ;;  %v275_v13 = vld [vmem:[#allocation10 + $0x10] sm:$0xff]  ;;  %v278_v17 = vld [vmem:[#allocation10 + $0x28] sm:$0xff]  ;;  %v280_v20 = vld [vmem:[#allocation10 + $0x38] sm:$0xff]  ;;  %p807_p6 = scmp.ne.s32.totalorder %s468_s18, %s806_s19  ;;  %p812_p8 = scmp.lt.s32.totalorder %s806_s19, %s806_s19 }
  0x71   :  { %614 = vmatprep.subr.bf16.mxu0 %v846_v0  ;;  %638 = vmatprep.subr.bf16.mxu1 %v846_v0  ;;  %v618_v15 = vpack.c.bf16 %v276_v14, %v275_v13  ;;  %v621_v18 = vpack.c.bf16 %v278_v17, %v277_v16  ;;  %v279_v19 = vld [vmem:[#allocation10 + $0x30] sm:$0xff]  ;;  %v281_v22 = vld [vmem:[#allocation10 + $0x40] sm:$0xff]  ;;  %v282_v23 = vld [vmem:[#allocation10 + $0x48] sm:$0xff] }
  0x72   :  { %v624_v21 = vpack.c.bf16 %v280_v20, %v279_v19  ;;  %v627_v24 = vpack.c.bf16 %v282_v23, %v281_v22  ;;  %v283_v25 = vld [vmem:[#allocation10 + $0x50] sm:$0xff]  ;;  %v284_v26 = vld [vmem:[#allocation10 + $0x58] sm:$0xff]  ;;  %v285_v28 = vld [vmem:[#allocation10 + $0x60] sm:$0xff]  ;;  %p813_p9 = por %p812_p8, %p811_p7 }
  0x73   :  { %529 = vmatmul.mubr.msk.f32.vlgmr.msra.gmra.mrb[0].mxu0 %vm117_vm1, %v112_v10  ;;  %536 = vmatmul.mubr.msk.f32.vlgmr.msra.gmra.mrb[0].mxu1 %vm117_vm1, %v111_v12  ;;  %v630_v27 = vpack.c.bf16 %v284_v26, %v283_v25  ;;  %v286_v29 = vld [vmem:[#allocation10 + $0x68] sm:$0xff]  ;;  %v287_v31 = vld [vmem:[#allocation10 + $0x70] sm:$0xff]  ;;  %v288_v32 = vld [vmem:[#allocation10 + $0x78] sm:$0xff] }
  0x74   :  { %616 = vmatpush3.bf16.msra.mxu0 %v615_v11  ;;  %570 = vmatprep.mubr.msk.f32.mxu0 %vm847_vm0, %v848_v1  ;;  %v633_v30 = vpack.c.bf16 %v286_v29, %v285_v28  ;;  %v636_v33 = vpack.c.bf16 %v288_v32, %v287_v31  ;;  %v367_v34 = vld [vmem:[#allocation11] sm:$0xff]  ;;  %v368_v35 = vld [vmem:[#allocation11 + $0x8] sm:$0xff]  ;;  %v369_v36 = vld [vmem:[#allocation11 + $0x10] sm:$0xff]  ;;  %p814_p10 = pnand %p813_p9, %p807_p6 }
  0x75   :  { %617 = vmatprep.subr.bf16.mxu0 %v846_v0  ;;  %605 = vmatprep.mubr.msk.f32.mxu1 %vm847_vm0, %v848_v1  ;;  %v639_v37 = vpack.c.bf16 %v368_v35, %v367_v34  ;;  %v370_v38 = vld [vmem:[#allocation11 + $0x18] sm:$0xff]  ;;  %v371_v40 = vld [vmem:[#allocation11 + $0x20] sm:$0xff]  ;;  %v372_v41 = vld [vmem:[#allocation11 + $0x28] sm:$0xff] }
  0x76   :  { %v642_v39 = vpack.c.bf16 %v370_v38, %v369_v36  ;;  %v645_v42 = vpack.c.bf16 %v372_v41, %v371_v40  ;;  %v373_v43 = vld [vmem:[#allocation11 + $0x30] sm:$0xff]  ;;  %v374_v44 = vld [vmem:[#allocation11 + $0x38] sm:$0xff]  ;;  %v375_v46 = vld [vmem:[#allocation11 + $0x40] sm:$0xff] }
  0x77   :  { %640 = vmatpush3.bf16.msra.mxu1 %v639_v37  ;;  %v648_v45 = vpack.c.bf16 %v374_v44, %v373_v43  ;;  %v376_v47 = vld [vmem:[#allocation11 + $0x48] sm:$0xff]  ;;  %v377_v49 = vld [vmem:[#allocation11 + $0x50] sm:$0xff]  ;;  %v378_v50 = vld [vmem:[#allocation11 + $0x58] sm:$0xff] }
  0x78   :  { %619 = vmatpush3.bf16.msra.mxu0 %v618_v15  ;;  %641 = vmatprep.subr.bf16.mxu1 %v846_v0  ;;  %v651_v48 = vpack.c.bf16 %v376_v47, %v375_v46  ;;  %v654_v51 = vpack.c.bf16 %v378_v50, %v377_v49  ;;  %v379_v52 = vld [vmem:[#allocation11 + $0x60] sm:$0xff]  ;;  %v380_v53 = vld [vmem:[#allocation11 + $0x68] sm:$0xff]  ;;  %v481_v57 = vld [vmem:[%s1031_s4] ss:$0 sm:$0xff] }
  0x79   :  { %620 = vmatprep.subr.bf16.mxu0 %v846_v0  ;;  %v657_v54 = vpack.c.bf16 %v380_v53, %v379_v52  ;;  %v381_v63 = vld [vmem:[#allocation11 + $0x70] sm:$0xff]  ;;  %v382_v1 = vld [vmem:[#allocation11 + $0x78] sm:$0xff] }
  0x7a   :  { %v660_v2 = vpack.c.bf16 %v382_v1, %v381_v63  ;;  %v483_v7 = vld [vmem:[%s1035_s8] ss:$0 sm:$0xff] }
  0x7b   :  { %643 = vmatpush3.bf16.msra.mxu1 %v642_v39 }
  0x7c   :  { %622 = vmatpush3.bf16.msra.mxu0 %v621_v18  ;;  %644 = vmatprep.subr.bf16.mxu1 %v846_v0 }
  0x7d   :  { %623 = vmatprep.subr.bf16.mxu0 %v846_v0 }
  0x7f   :  { %646 = vmatpush3.bf16.msra.mxu1 %v645_v42 }
  0x80   :  { %625 = vmatpush3.bf16.msra.mxu0 %v624_v21  ;;  %647 = vmatprep.subr.bf16.mxu1 %v846_v0 }
  0x81   :  { %626 = vmatprep.subr.bf16.mxu0 %v846_v0 }
  0x83   :  { %649 = vmatpush3.bf16.msra.mxu1 %v648_v45 }
  0x84   :  { %628 = vmatpush3.bf16.msra.mxu0 %v627_v24  ;;  %650 = vmatprep.subr.bf16.mxu1 %v846_v0 }
  0x85   :  { %629 = vmatprep.subr.bf16.mxu0 %v846_v0 }
  0x87   :  { %652 = vmatpush3.bf16.msra.mxu1 %v651_v48 }
  0x88   :  { %631 = vmatpush3.bf16.msra.mxu0 %v630_v27  ;;  %653 = vmatprep.subr.bf16.mxu1 %v846_v0 }
  0x89   :  { %632 = vmatprep.subr.bf16.mxu0 %v846_v0 }
  0x8b   :  { %655 = vmatpush3.bf16.msra.mxu1 %v654_v51 }
  0x8c   :  { %634 = vmatpush3.bf16.msra.mxu0 %v633_v30  ;;  %656 = vmatprep.subr.bf16.mxu1 %v846_v0 }
  0x8d   :  { %635 = vmatprep.subr.bf16.mxu0 %v846_v0 }
  0x8f   :  { %658 = vmatpush3.bf16.msra.mxu1 %v657_v54 }
  0x90   :  { %637 = vmatpush3.bf16.msra.mxu0 %v636_v33  ;;  %659 = vmatprep.subr.bf16.mxu1 %v846_v0  ;;  %v482_v0 = vld [vmem:[%s1033_s6] ss:$0 sm:$0xff] }
  0x93   :  { %661 = vmatpush3.bf16.msra.mxu1 %v660_v2 }
 0x146   :  { %v187_v55 = vpop.f32.mrb[0].mxu0  ;;  %v260_v56 = vpop.f32.mrb[0].mxu1 }
 0x147   :  { %v530_v58 = vpop.f32.mrb[1].mxu0  ;;  %v261_v59 = vadd.f32 %v260_v56, %v187_v55  ;;  %v537_v60 = vpop.f32.mrb[1].mxu1 }
 0x149   :  { %v271_v61 = vadd.f32 %v481_v57, %v261_v59 }
 0x14b   :  { %v272_v62 = vmax.f32 %v271_v61, 0.0 }
 0x14d   :  { %571 = vmatmul.mubr.f32.vlgmr.msra.gmra.mrb[2].mxu0 %v272_v62 }
 0x220   :  { %v362_v3 = vpop.f32.mrb[2].mxu0 }
 0x221   :  { %v363_v4 = vadd.f32 %v482_v0, %v362_v3  ;;  %v572_v5 = vpop.f32.mrb[3].mxu0 }
 0x223   :  { %v366_v6 = vmax.f32 %v363_v4, 0.0 }
 0x225   :  { %606 = vmatmul.mubr.f32.vlgmr.msra.gmra.mrb[2].mxu1 %v366_v6 }
 0x2f8   :  { %v456_v8 = vpop.f32.mrb[2].mxu1 }
 0x2f9   :  { %v457_v9 = vadd.f32 %v483_v7, %v456_v8  ;;  %v607_v10 = vpop.f32.mrb[3].mxu1 }
 0x2fb   :  { %460 = vst [vmem:[#allocation13] sm:$0xff] %v457_v9 }
 0x2fc   :  { %817 = shalt.err (!%p814_p10)
}
 0x2fd   :  { %s818_s21 = scalar_lea.hbm %s1036_s9, 128 }
 0x2fe   :  { %p819_p11 = scmp.ne.s32.totalorder %s1036_s9, %s818_s21  ;;  %p822_p12 = scmp.lt.u32.totalorder %s818_s21, %s1036_s9 }
 0x300   :  { %p824_p13 = pnand %p822_p12, %p819_p11 }
 0x302   :  { %827 = shalt.err (!%p824_p13)
}
 0x303   :  { %470 = dma.vmem_to_hbm [thread:$0]  %s468_s18, 128, %s1036_s9, [#allocation4]  }
 0x304   :  { %836 = dma.done.wait [#allocation4], 128  }
 0x305   :  { %837 = vsyncadd [#allocation4], 4294967168 }
 0x306   :  { %474 = vsyncpa [#allocation3], 1 }
 0x307   :  { %475 = vsyncpa [#allocation6], 1 }
 0x308   :  { %476 = vsyncpa [#allocation9], 1 }
 0x309   :  { %477 = vsyncpa [#allocation12], 1 }
 0x30a   :  { %478 = vsyncpa [#allocation4], 1 }

</bundles_post_ra>
